<compile_context>
chip_gen: v6e
topology: v6e:2x2x1
jax: 0.10.0
libtpu: 0.0.40
codegen_flags: <defaults>
</compile_context>

<pallas_src>
import jax
import jax.numpy as jnp
from jax.experimental import pallas as pl
from jax.experimental.pallas import tpu as pltpu

INPUT_SIZE = 768   # bert-base hidden size (6 * 128, lane-aligned as-is)
H1 = 100
H2 = 50
H3 = 1

# Lane-aligned padded widths used inside the kernel.  Padding columns/rows of
# the weights/biases are zero, so ReLU(0) = 0 and padded lanes contribute
# nothing downstream; fc3's padded weight lanes are zero as well.
H1_PAD = 128
H2_PAD = 128

TB_MAX = 2048           # batch-tile cap: ~20 MiB VMEM at TB=2048 with f32 x
VMEM_LIMIT = 48 << 20   # above v5e's 16 MiB / default 32 MiB scoped limits,
                        # still well inside v7x's 64 MiB physical VMEM


def _round_up(n, m):
    return ((n + m - 1) // m) * m


def _pick_tb(B):
    """Pick the batch tile.

    Small B: one grid step, TB rounded to 8 (f32 sublane tile); the block may
    exceed B (partial block) — those rows are garbage but independent and are
    sliced off by the wrapper.
    Large B: TB is a multiple of 128/512 (keeps the lane-dense (1, TB) output
    block legal when grid > 1) sized for ~8 grid steps so both v7x
    TensorCores get >= 4 pipelined steps, capped at TB_MAX.
    """
    if B <= TB_MAX:
        return _round_up(B, 8)
    tb = _round_up(pl.cdiv(B, 8), 512)
    return max(128, min(TB_MAX, tb))


def _mlp_kernel(x_ref, w1_ref, b1_ref, w2_ref, b2_ref, w3_ref, b3_ref, o_ref):
    # In-kernel cast to bf16 (hidden under the x DMA): HBM carries x once as
    # f32, the MXU still sees its native dtype.
    xb = x_ref[...].astype(jnp.bfloat16)

    # fc1: bf16 operands on the MXU, f32 accumulation; bias + ReLU in f32
    # (v5e's VPU has no bf16).
    h1 = jnp.dot(xb, w1_ref[...], preferred_element_type=jnp.float32)
    h1 = jnp.maximum(h1 + b1_ref[...], 0.0)

    # fc2: same pattern.
    h2 = jnp.dot(h1.astype(jnp.bfloat16), w2_ref[...],
                 preferred_element_type=jnp.float32)
    h2 = jnp.maximum(h2 + b2_ref[...], 0.0)

    # fc3 (50 valid -> 1) computed as (1,128) @ (TB,128)^T -> (1, TB) so the
    # logits (and the output block) are lane-dense: dense vregs, unmasked
    # stores, contiguous writeback.  Kept in f32 (tiny M=1 matmul).
    logits = jax.lax.dot_general(
        w3_ref[...], h2, (((1,), (1,)), ((), ())),
        preferred_element_type=jnp.float32) + b3_ref[...]

    # Numerically-stable sigmoid (no exp overflow for very negative logits).
    z = jnp.exp(-jnp.abs(logits))
    o_ref[...] = jnp.where(logits >= 0.0, 1.0 / (1.0 + z), z / (1.0 + z))


@jax.jit
def bert_classifier_forward(x, padded_params):
    """x: [B, 768] float32 embeddings -> [B, 1] sigmoid probabilities."""
    w1p, b1p, w2p, b2p, w3p, b3p = padded_params
    B = x.shape[0]

    TB = _pick_tb(B)
    grid = pl.cdiv(B, TB)
    B_pad = grid * TB

    out = pl.pallas_call(
        _mlp_kernel,
        out_shape=jax.ShapeDtypeStruct((1, B_pad), jnp.float32),
        grid=(grid,),
        in_specs=[
            pl.BlockSpec((TB, INPUT_SIZE), lambda i: (i, 0)),        # x (f32)
            pl.BlockSpec((INPUT_SIZE, H1_PAD), lambda i: (0, 0)),    # w1 (bf16)
            pl.BlockSpec((1, H1_PAD), lambda i: (0, 0)),             # b1 (f32)
            pl.BlockSpec((H1_PAD, H2_PAD), lambda i: (0, 0)),        # w2 (bf16)
            pl.BlockSpec((1, H2_PAD), lambda i: (0, 0)),             # b2 (f32)
            pl.BlockSpec((1, H2_PAD), lambda i: (0, 0)),             # w3 row (f32)
            pl.BlockSpec((1, 1), lambda i: (0, 0)),                  # b3 (f32)
        ],
        out_specs=pl.BlockSpec((1, TB), lambda i: (0, i)),           # lane-dense
        compiler_params=pltpu.CompilerParams(
            dimension_semantics=("parallel",),
            vmem_limit_bytes=VMEM_LIMIT),
    )(x, w1p, b1p, w2p, b2p, w3p, b3p)

    # Drop the (garbage) rows of the last partial block and return [B, 1].
    return out[0, :B].reshape(B, 1)


def prepare_params(params):
    """One-time padding/casting of the weights (hoisted out of the forward)."""
    w1, b1, w2, b2, w3, b3 = params
    w1p = jnp.zeros((INPUT_SIZE, H1_PAD), jnp.bfloat16).at[:, :H1].set(
        w1.astype(jnp.bfloat16))
    b1p = jnp.zeros((1, H1_PAD), jnp.float32).at[:, :H1].set(b1)
    w2p = jnp.zeros((H1_PAD, H2_PAD), jnp.bfloat16).at[:H1, :H2].set(
        w2.astype(jnp.bfloat16))
    b2p = jnp.zeros((1, H2_PAD), jnp.float32).at[:, :H2].set(b2)
    # fc3 weights as an f32 row vector; padded lanes are zero.
    w3p = jnp.zeros((1, H2_PAD), jnp.float32).at[:, :H2].set(w3[:, 0])
    b3p = b3.reshape(1, 1).astype(jnp.float32)
    return (w1p, b1p, w2p, b2p, w3p, b3p)


def init_params(key):
    """Deterministic init mimicking nn.Linear default (uniform +/- 1/sqrt(fan_in))."""
    ks = jax.random.split(key, 6)

    def linear(kw, kb, fan_in, fan_out):
        bound = 1.0 / jnp.sqrt(fan_in)
        w = jax.random.uniform(kw, (fan_in, fan_out), jnp.float32, -bound, bound)
        b = jax.random.uniform(kb, (fan_out,), jnp.float32, -bound, bound)
        return w, b

    w1, b1 = linear(ks[0], ks[1], INPUT_SIZE, H1)
    w2, b2 = linear(ks[2], ks[3], H1, H2)
    w3, b3 = linear(ks[4], ks[5], H2, H3)
    return (w1, b1, w2, b2, w3, b3)


def reference_forward_matched(x, params):
    """Pure-JAX reference matching the kernel's precision recipe
    (bf16 matmul operands for fc1/fc2, f32 accumulation; fc3 entirely f32)."""
    w1, b1, w2, b2, w3, b3 = params
    f32 = jnp.float32
    hp = jax.lax.Precision.HIGHEST
    xb = x.astype(jnp.bfloat16).astype(f32)
    w1b = w1.astype(jnp.bfloat16).astype(f32)
    w2b = w2.astype(jnp.bfloat16).astype(f32)
    h1 = jax.nn.relu(jnp.dot(xb, w1b, precision=hp) + b1)
    h1b = h1.astype(jnp.bfloat16).astype(f32)
    h2 = jax.nn.relu(jnp.dot(h1b, w2b, precision=hp) + b2)
    logits = jnp.dot(h2, w3, precision=hp) + b3
    return jax.nn.sigmoid(logits)


def reference_forward_f32(x, params):
    """Full f32 reference (loose sanity check given the bf16 matmul inputs)."""
    w1, b1, w2, b2, w3, b3 = params
    hp = jax.lax.Precision.HIGHEST
    h1 = jax.nn.relu(jnp.dot(x, w1, precision=hp) + b1)
    h2 = jax.nn.relu(jnp.dot(h1, w2, precision=hp) + b2)
    return jax.nn.sigmoid(jnp.dot(h2, w3, precision=hp) + b3)


if __name__ == "__main__":
    key = jax.random.PRNGKey(0)
    k_x, k_p = jax.random.split(key)

    B = 8  # small batch of precomputed [CLS] embeddings
    x = jax.random.normal(k_x, (B, INPUT_SIZE), jnp.float32)
    params = init_params(k_p)
    padded_params = prepare_params(params)  # done once, outside the forward

    y = bert_classifier_forward(x, padded_params)
    y = jax.block_until_ready(y)

    assert y.shape == (B, 1)

    y_ref = reference_forward_matched(x, params)
    assert jnp.allclose(y, y_ref, atol=1e-3, rtol=1e-3), (
        f"mismatch vs matched-precision reference: "
        f"max abs diff {jnp.max(jnp.abs(y - y_ref))}")

    y_f32 = reference_forward_f32(x, params)
    assert jnp.allclose(y, y_f32, atol=3e-2), (
        f"too far from f32 reference: max abs diff {jnp.max(jnp.abs(y - y_f32))}")

    print("KERNEL_OK")
</pallas_src>

<mosaic_0001>
module attributes {stable_mosaic.version = 11 : i64} {
  func.func @_mlp_kernel(%arg0: i32, %arg1: memref<8x768xf32, #tpu.memory_space<vmem>>, %arg2: memref<768x128xbf16, #tpu.memory_space<vmem>>, %arg3: memref<1x128xf32, #tpu.memory_space<vmem>>, %arg4: memref<128x128xbf16, #tpu.memory_space<vmem>>, %arg5: memref<1x128xf32, #tpu.memory_space<vmem>>, %arg6: memref<1x128xf32, #tpu.memory_space<vmem>>, %arg7: memref<1x1xf32, #tpu.memory_space<vmem>>, %arg8: memref<1x8xf32, #tpu.memory_space<vmem>>) attributes {dimension_semantics = [#tpu.dimension_semantics<parallel>], iteration_bounds = array<i64: 1>, scalar_prefetch = 0 : i64, scratch_operands = 0 : i64, tpu.core_type = #tpu.core_type<tc>, window_params = [{transform_indices = @transform_0, window_bounds = array<i64: 8, 768>}, {pipeline_mode = #tpu.pipeline_mode<synchronous>, transform_indices = @transform_1, window_bounds = array<i64: 768, 128>}, {pipeline_mode = #tpu.pipeline_mode<synchronous>, transform_indices = @transform_2, window_bounds = array<i64: 1, 128>}, {pipeline_mode = #tpu.pipeline_mode<synchronous>, transform_indices = @transform_3, window_bounds = array<i64: 128, 128>}, {pipeline_mode = #tpu.pipeline_mode<synchronous>, transform_indices = @transform_4, window_bounds = array<i64: 1, 128>}, {pipeline_mode = #tpu.pipeline_mode<synchronous>, transform_indices = @transform_5, window_bounds = array<i64: 1, 128>}, {pipeline_mode = #tpu.pipeline_mode<synchronous>, transform_indices = @transform_6, window_bounds = array<i64: 1, 1>}, {transform_indices = @transform_7, window_bounds = array<i64: 1, 8>}]} {
    %c0 = arith.constant 0 : index
    %c0_0 = arith.constant 0 : index
    %0 = vector.load %arg1[%c0, %c0_0] : memref<8x768xf32, #tpu.memory_space<vmem>>, vector<8x768xf32>
    %1 = arith.truncf %0 : vector<8x768xf32> to vector<8x768xbf16>
    %c0_1 = arith.constant 0 : index
    %c0_2 = arith.constant 0 : index
    %2 = vector.load %arg2[%c0_1, %c0_2] : memref<768x128xbf16, #tpu.memory_space<vmem>>, vector<768x128xbf16>
    %cst = arith.constant dense<0.000000e+00> : vector<8x128xf32>
    %3 = tpu.matmul %1, %2, %cst {dimension_numbers = #tpu.dot_dimension_numbers<[1], [0], [0], [1], [0, 0, 1, 1], [], []>} : vector<8x768xbf16>, vector<768x128xbf16>, vector<8x128xf32> -> vector<8x128xf32>
    %c0_3 = arith.constant 0 : index
    %c0_4 = arith.constant 0 : index
    %4 = vector.load %arg3[%c0_3, %c0_4] : memref<1x128xf32, #tpu.memory_space<vmem>>, vector<1x128xf32>
    %5 = vector.broadcast %4 : vector<1x128xf32> to vector<8x128xf32>
    %6 = arith.addf %3, %5 : vector<8x128xf32>
    %cst_5 = arith.constant 0.000000e+00 : f32
    %7 = vector.broadcast %cst_5 : f32 to vector<8x128xf32>
    %8 = arith.maximumf %6, %7 : vector<8x128xf32>
    %9 = arith.truncf %8 : vector<8x128xf32> to vector<8x128xbf16>
    %c0_6 = arith.constant 0 : index
    %c0_7 = arith.constant 0 : index
    %10 = vector.load %arg4[%c0_6, %c0_7] : memref<128x128xbf16, #tpu.memory_space<vmem>>, vector<128x128xbf16>
    %cst_8 = arith.constant dense<0.000000e+00> : vector<8x128xf32>
    %11 = tpu.matmul %9, %10, %cst_8 {dimension_numbers = #tpu.dot_dimension_numbers<[1], [0], [0], [1], [0, 0, 1, 1], [], []>} : vector<8x128xbf16>, vector<128x128xbf16>, vector<8x128xf32> -> vector<8x128xf32>
    %c0_9 = arith.constant 0 : index
    %c0_10 = arith.constant 0 : index
    %12 = vector.load %arg5[%c0_9, %c0_10] : memref<1x128xf32, #tpu.memory_space<vmem>>, vector<1x128xf32>
    %13 = vector.broadcast %12 : vector<1x128xf32> to vector<8x128xf32>
    %14 = arith.addf %11, %13 : vector<8x128xf32>
    %cst_11 = arith.constant 0.000000e+00 : f32
    %15 = vector.broadcast %cst_11 : f32 to vector<8x128xf32>
    %16 = arith.maximumf %14, %15 : vector<8x128xf32>
    %c0_12 = arith.constant 0 : index
    %c0_13 = arith.constant 0 : index
    %17 = vector.load %arg6[%c0_12, %c0_13] : memref<1x128xf32, #tpu.memory_space<vmem>>, vector<1x128xf32>
    %cst_14 = arith.constant dense<0.000000e+00> : vector<1x8xf32>
    %18 = tpu.matmul %17, %16, %cst_14 {dimension_numbers = #tpu.dot_dimension_numbers<[1], [1], [0], [0], [0, 0, 1, 0], [], []>} : vector<1x128xf32>, vector<8x128xf32>, vector<1x8xf32> -> vector<1x8xf32>
    %c0_15 = arith.constant 0 : index
    %c0_16 = arith.constant 0 : index
    %19 = vector.load %arg7[%c0_15, %c0_16] : memref<1x1xf32, #tpu.memory_space<vmem>>, vector<1x1xf32>
    %20 = vector.broadcast %19 : vector<1x1xf32> to vector<1x8xf32>
    %21 = arith.addf %18, %20 : vector<1x8xf32>
    %22 = math.absf %21 : vector<1x8xf32>
    %cst_17 = arith.constant 0.000000e+00 : f32
    %23 = vector.broadcast %cst_17 : f32 to vector<1x8xf32>
    %24 = arith.subf %23, %22 : vector<1x8xf32>
    %25 = math.exp %24 : vector<1x8xf32>
    %cst_18 = arith.constant 0.000000e+00 : f32
    %26 = vector.broadcast %cst_18 : f32 to vector<1x8xf32>
    %27 = arith.cmpf oge, %21, %26 : vector<1x8xf32>
    %cst_19 = arith.constant 1.000000e+00 : f32
    %28 = vector.broadcast %cst_19 : f32 to vector<1x8xf32>
    %29 = arith.addf %28, %25 : vector<1x8xf32>
    %cst_20 = arith.constant 1.000000e+00 : f32
    %30 = vector.broadcast %cst_20 : f32 to vector<1x8xf32>
    %31 = arith.divf %30, %29 : vector<1x8xf32>
    %cst_21 = arith.constant 1.000000e+00 : f32
    %32 = vector.broadcast %cst_21 : f32 to vector<1x8xf32>
    %33 = arith.addf %32, %25 : vector<1x8xf32>
    %34 = arith.divf %25, %33 : vector<1x8xf32>
    %35 = arith.select %27, %31, %34 : vector<1x8xi1>, vector<1x8xf32>
    %c0_22 = arith.constant 0 : index
    %c0_23 = arith.constant 0 : index
    %36 = vector.load %arg8[%c0_22, %c0_23] : memref<1x8xf32, #tpu.memory_space<vmem>>, vector<1x8xf32>
    tpu.vector_store %arg8[%c0_22, %c0_23], %35 {strides = array<i32>} : memref<1x8xf32, #tpu.memory_space<vmem>>, vector<1x8xf32>,
    return
  }
  func.func @transform_0(%arg0: i32) -> (i32, i32) {
    %c0_i32 = arith.constant 0 : i32
    %c0_i32_0 = arith.constant 0 : i32
    return %arg0, %c0_i32 : i32, i32
  }
  func.func @transform_1(%arg0: i32) -> (i32, i32) {
    %c0_i32 = arith.constant 0 : i32
    %c0_i32_0 = arith.constant 0 : i32
    %c0_i32_1 = arith.constant 0 : i32
    return %c0_i32, %c0_i32_0 : i32, i32
  }
  func.func @transform_2(%arg0: i32) -> (i32, i32) {
    %c0_i32 = arith.constant 0 : i32
    %c0_i32_0 = arith.constant 0 : i32
    %c0_i32_1 = arith.constant 0 : i32
    return %c0_i32, %c0_i32_0 : i32, i32
  }
  func.func @transform_3(%arg0: i32) -> (i32, i32) {
    %c0_i32 = arith.constant 0 : i32
    %c0_i32_0 = arith.constant 0 : i32
    %c0_i32_1 = arith.constant 0 : i32
    return %c0_i32, %c0_i32_0 : i32, i32
  }
  func.func @transform_4(%arg0: i32) -> (i32, i32) {
    %c0_i32 = arith.constant 0 : i32
    %c0_i32_0 = arith.constant 0 : i32
    %c0_i32_1 = arith.constant 0 : i32
    return %c0_i32, %c0_i32_0 : i32, i32
  }
  func.func @transform_5(%arg0: i32) -> (i32, i32) {
    %c0_i32 = arith.constant 0 : i32
    %c0_i32_0 = arith.constant 0 : i32
    %c0_i32_1 = arith.constant 0 : i32
    return %c0_i32, %c0_i32_0 : i32, i32
  }
  func.func @transform_6(%arg0: i32) -> (i32, i32) {
    %c0_i32 = arith.constant 0 : i32
    %c0_i32_0 = arith.constant 0 : i32
    %c0_i32_1 = arith.constant 0 : i32
    return %c0_i32, %c0_i32_0 : i32, i32
  }
  func.func @transform_7(%arg0: i32) -> (i32, i32) {
    %c0_i32 = arith.constant 0 : i32
    %c0_i32_0 = arith.constant 0 : i32
    return %c0_i32, %arg0 : i32, i32
  }
}

</mosaic_0001>

<bundles_post_ra>
// kernel: bert_classifier_forward.1
= control target key start
LH: loop header
LB: loop body
LE: loop exit
PB: predicated region body
PF: predicated region fallthrough
CT: control target
= control target key end

     0   :  { %s1204_s0 = inlined_call_operand.hbm [shape: f32[8,768], index: 0, kind: input, shape index: {}]   ;;  %s1205_s1 = inlined_call_operand.hbm [shape: bf16[768,128], index: 1, kind: input, shape index: {}]   ;;  %s1206_s2 = inlined_call_operand.vmem [shape: f32[1,128], index: 2, kind: input, shape index: {}]   ;;  %s1207_s3 = inlined_call_operand.hbm [shape: bf16[128,128], index: 3, kind: input, shape index: {}]   ;;  %s1208_s4 = inlined_call_operand.vmem [shape: f32[1,128], index: 4, kind: input, shape index: {}]   ;;  %s1209_s5 = inlined_call_operand.vmem [shape: f32[1,128], index: 5, kind: input, shape index: {}]   ;;  %s1210_s6 = inlined_call_operand.<no memory space> [shape: f32[1,1], index: 6, kind: input, shape index: {}]   ;;  %s1211_s7 = inlined_call_operand.hbm [shape: f32[1,8], index: 7, kind: output, shape index: {}]  }
   0x1   :  { %v12_v0 = vstv %s1210_s6 }
   0x2   :  { %13 = vst [vmem:[#allocation2] sm:$0x1] %v12_v0 }
   0x3   :  { %14 = vsyncpa [#allocation4], 0 }
   0x4   :  { %15 = vsyncpa [#allocation7], 0 }
   0x5   :  { %16 = vsyncpa [#allocation5], 0  ;;  %s1131_s26 = smov [#allocation6]  }
   0x6   :  { %s32_s27 = sshll.u32 %s1131_s26, 4  ;;  %s33_s27 = int_to_ptr.vmem [resolvable:$true] %s32_s27 }
   0x7   :  { %s1053_s28 = scalar_lea.vmem %s33_s27, 6144  ;;  %p1058_p1 = scmp.lt.s32.totalorder %s33_s27, %s33_s27 }
   0x8   :  { %p1054_p0 = scmp.ne.s32.totalorder %s33_s27, %s1053_s28  ;;  %p1059_p2 = scmp.lt.s32.totalorder %s1053_s28, %s1053_s28 }
   0xa   :  { %p1060_p3 = por %p1059_p2, %p1058_p1 }
   0xc   :  { %p1061_p4 = pnand %p1060_p3, %p1054_p0 }
   0xe   :  { %1064 = shalt.err (!%p1061_p4)
}
   0xf   :  { %s1132_s29 = smov 64   ;;  %s1133_s30 = smov 4  }
  0x10   :  { %38 = dma.hbm_to_vmem [thread:$0]  %s1205_s1, 6144, %s33_s27, [#allocation7], %s1132_s29, %s1132_s29, %s1133_s30  }
  0x11   :  { %s1134_s6 = smov [#allocation3]   ;;  %s1135_s11 = smov [#allocation8]  }
  0x12   :  { %s23_s10 = sshll.u32 %s1134_s6, 4  ;;  %s46_s12 = sshll.u32 %s1135_s11, 4  ;;  %s24_s10 = int_to_ptr.vmem [resolvable:$true] %s23_s10  ;;  %s47_s12 = int_to_ptr.vmem [resolvable:$true] %s46_s12 }
  0x13   :  { %s1073_s13 = scalar_lea.vmem %s24_s10, 768  ;;  %p1078_p6 = scmp.lt.s32.totalorder %s24_s10, %s24_s10 }
  0x14   :  { %p1074_p5 = scmp.ne.s32.totalorder %s24_s10, %s1073_s13  ;;  %p1079_p7 = scmp.lt.s32.totalorder %s1073_s13, %s1073_s13 }
  0x16   :  { %p1080_p8 = por %p1079_p7, %p1078_p6 }
  0x18   :  { %p1081_p9 = pnand %p1080_p8, %p1074_p5 }
  0x1a   :  { %1084 = shalt.err (!%p1081_p9)
}
  0x1b   :  { %26 = dma.hbm_to_vmem [thread:$0]  %s1204_s0, 768, %s24_s10, [#allocation4]  }
  0x1c   :  { %s1093_s16 = scalar_lea.vmem %s47_s12, 1024  ;;  %p1098_p11 = scmp.lt.s32.totalorder %s47_s12, %s47_s12 }
  0x1d   :  { %p1094_p10 = scmp.ne.s32.totalorder %s47_s12, %s1093_s16  ;;  %p1099_p12 = scmp.lt.s32.totalorder %s1093_s16, %s1093_s16 }
  0x1f   :  { %p1100_p13 = por %p1099_p12, %p1098_p11 }
  0x21   :  { %p1101_p0 = pnand %p1100_p13, %p1094_p10 }
  0x23   :  { %1104 = shalt.err (!%p1101_p0)
}
  0x24   :  { %52 = dma.hbm_to_vmem [thread:$0]  %s1207_s3, 1024, %s47_s12, [#allocation7], %s1132_s29, %s1132_s29, %s1133_s30  }
  0x25   :  { %1125 = dma.done.wait [#allocation4], 768  }
  0x26   :  { %1126 = vsyncadd [#allocation4], 4294966528 }
  0x27   :  { %1127 = dma.done.wait [#allocation7], 7168  }
  0x28   :  { %1128 = vsyncadd [#allocation7], 4294960128  ;;  %v985_v1 = vld [vmem:[#allocation6 + $0x78] sm:$0xff]   ;;  %v989_v5 = vld [vmem:[#allocation6 + $0x70] sm:$0xff]   ;;  %v1136_v62 = vmov 0.0   ;;  %vm1137_vm0 = vmmov 0  }
  0x29   :  { %v986_v2 = vld [vmem:[#allocation6 + $0x38] sm:$0xff]   ;;  %873 = vmatprep.subr.bf16.mxu0 %v985_v1  ;;  %v990_v6 = vld [vmem:[#allocation6 + $0x30] sm:$0xff]   ;;  %v993_v9 = vld [vmem:[#allocation6 + $0x68] sm:$0xff]   ;;  %vm797_vm1 = vcmask 57344  }
  0x2a   :  { %v987_v3 = vld [vmem:[#allocation6 + $0xf8] sm:$0xff]   ;;  %874 = vmatpush3.bf16.msra.mxu0 %v986_v2  ;;  %v991_v7 = vld [vmem:[#allocation6 + $0xf0] sm:$0xff]   ;;  %v994_v10 = vld [vmem:[#allocation6 + $0x28] sm:$0xff]  }
  0x2b   :  { %v988_v4 = vld [vmem:[#allocation6 + $0xb8] sm:$0xff]   ;;  %895 = vmatprep.subr.bf16.mxu1 %v987_v3  ;;  %875 = vmatprep.subr.bf16.mxu0 %v989_v5  ;;  %v992_v8 = vld [vmem:[#allocation6 + $0xb0] sm:$0xff]   ;;  %v995_v11 = vld [vmem:[#allocation6 + $0xe8] sm:$0xff]  }
  0x2c   :  { %896 = vmatpush3.bf16.msra.mxu1 %v988_v4  ;;  %v996_v12 = vld [vmem:[#allocation6 + $0xa8] sm:$0xff]   ;;  %v997_v13 = vld [vmem:[#allocation6 + $0x60] sm:$0xff]   ;;  %v1001_v17 = vld [vmem:[#allocation6 + $0x58] sm:$0xff]  }
  0x2d   :  { %897 = vmatprep.subr.bf16.mxu1 %v991_v7  ;;  %v998_v14 = vld [vmem:[#allocation6 + $0x20] sm:$0xff]   ;;  %v1002_v18 = vld [vmem:[#allocation6 + $0x18] sm:$0xff]   ;;  %v1005_v21 = vld [vmem:[#allocation6 + $0x50] sm:$0xff]  }
  0x2e   :  { %876 = vmatpush3.bf16.msra.mxu0 %v990_v6  ;;  %v999_v15 = vld [vmem:[#allocation6 + $0xe0] sm:$0xff]   ;;  %v1003_v19 = vld [vmem:[#allocation6 + $0xd8] sm:$0xff]   ;;  %v1006_v22 = vld [vmem:[#allocation6 + $0x10] sm:$0xff]  }
  0x2f   :  { %877 = vmatprep.subr.bf16.mxu0 %v993_v9  ;;  %v1000_v16 = vld [vmem:[#allocation6 + $0xa0] sm:$0xff]   ;;  %v1004_v20 = vld [vmem:[#allocation6 + $0x98] sm:$0xff]   ;;  %v1007_v23 = vld [vmem:[#allocation6 + $0xd0] sm:$0xff]  }
  0x30   :  { %898 = vmatpush3.bf16.msra.mxu1 %v992_v8  ;;  %v1008_v24 = vld [vmem:[#allocation6 + $0x90] sm:$0xff]   ;;  %v1009_v25 = vld [vmem:[#allocation6 + $0x48] sm:$0xff]   ;;  %v1013_v29 = vld [vmem:[#allocation6 + $0x40] sm:$0xff]  }
  0x31   :  { %899 = vmatprep.subr.bf16.mxu1 %v995_v11  ;;  %v1010_v26 = vld [vmem:[#allocation6 + $0x8] sm:$0xff]   ;;  %v1014_v30 = vld [vmem:[#allocation6] sm:$0xff]   ;;  %v70_v32 = vld [vmem:[#allocation3 + $0x8] sm:$0xff] }
  0x32   :  { %878 = vmatpush3.bf16.msra.mxu0 %v994_v10  ;;  %v1011_v27 = vld [vmem:[#allocation6 + $0xc8] sm:$0xff]   ;;  %v1015_v31 = vld [vmem:[#allocation6 + $0xc0] sm:$0xff]   ;;  %v76_v33 = vpack.c.bf16 %v70_v32, %v70_v32  ;;  %v69_v35 = vld [vmem:[#allocation3] sm:$0xff] }
  0x33   :  { %879 = vmatprep.subr.bf16.mxu0 %v997_v13  ;;  %v1012_v28 = vld [vmem:[#allocation6 + $0x88] sm:$0xff]   ;;  %v1016_v34 = vld [vmem:[#allocation6 + $0x80] sm:$0xff]   ;;  %v75_v36 = vpack.c.bf16 %v69_v35, %v69_v35  ;;  %v1017_v37 = vld [vmem:[#allocation6 + $0x178] sm:$0xff]  }
  0x34   :  { %900 = vmatpush3.bf16.msra.mxu1 %v996_v12  ;;  %v72_v38 = vld [vmem:[#allocation3 + $0x18] sm:$0xff]  ;;  %504 = vmatprep.mubr.bf16.mxu0 %v76_v33  ;;  %v1018_v40 = vld [vmem:[#allocation6 + $0x138] sm:$0xff]   ;;  %v71_v41 = vld [vmem:[#allocation3 + $0x10] sm:$0xff] }
  0x35   :  { %901 = vmatprep.subr.bf16.mxu1 %v999_v15  ;;  %v78_v39 = vpack.c.bf16 %v72_v38, %v72_v38  ;;  %v77_v42 = vpack.c.bf16 %v71_v41, %v71_v41  ;;  %v1019_v43 = vld [vmem:[#allocation6 + $0x170] sm:$0xff]   ;;  %v1021_v45 = vld [vmem:[#allocation6 + $0x168] sm:$0xff]   ;;  %v1023_v47 = vld [vmem:[#allocation6 + $0x160] sm:$0xff]  }
  0x36   :  { %880 = vmatpush3.bf16.msra.mxu0 %v998_v14  ;;  %v1020_v44 = vld [vmem:[#allocation6 + $0x130] sm:$0xff]   ;;  %v1022_v46 = vld [vmem:[#allocation6 + $0x128] sm:$0xff]   ;;  %v1024_v48 = vld [vmem:[#allocation6 + $0x120] sm:$0xff]  }
  0x37   :  { %881 = vmatprep.subr.bf16.mxu0 %v1001_v17  ;;  %544 = vmatprep.mubr.bf16.mxu1 %v78_v39  ;;  %v1025_v49 = vld [vmem:[#allocation6 + $0x158] sm:$0xff]   ;;  %v1027_v51 = vld [vmem:[#allocation6 + $0x150] sm:$0xff]   ;;  %v1029_v55 = vld [vmem:[#allocation6 + $0x148] sm:$0xff]  }
  0x38   :  { %902 = vmatpush3.bf16.msra.mxu1 %v1000_v16  ;;  %v1026_v50 = vld [vmem:[#allocation6 + $0x118] sm:$0xff]   ;;  %v1028_v53 = vld [vmem:[#allocation6 + $0x110] sm:$0xff]   ;;  %v1030_v56 = vld [vmem:[#allocation6 + $0x108] sm:$0xff]  }
  0x39   :  { %903 = vmatprep.subr.bf16.mxu1 %v1003_v19  ;;  %v74_v52 = vld [vmem:[#allocation3 + $0x28] sm:$0xff]  ;;  %v1031_v57 = vld [vmem:[#allocation6 + $0x140] sm:$0xff]   ;;  %v73_v59 = vld [vmem:[#allocation3 + $0x20] sm:$0xff] }
  0x3a   :  { %882 = vmatpush3.bf16.msra.mxu0 %v1002_v18  ;;  %v80_v54 = vpack.c.bf16 %v74_v52, %v74_v52  ;;  %v1032_v58 = vld [vmem:[#allocation6 + $0x100] sm:$0xff]   ;;  %v79_v60 = vpack.c.bf16 %v73_v59, %v73_v59  ;;  %v1033_v61 = vld [vmem:[#allocation8 + $0x38] sm:$0xff]   ;;  %v1034_v63 = vld [vmem:[#allocation8 + $0x30] sm:$0xff]  }
  0x3b   :  { %883 = vmatprep.subr.bf16.mxu0 %v1005_v21  ;;  %v1035_v0 = vld [vmem:[#allocation8 + $0x28] sm:$0xff]   ;;  %v1036_v1 = vld [vmem:[#allocation8 + $0x20] sm:$0xff]   ;;  %v1037_v2 = vld [vmem:[#allocation8 + $0x18] sm:$0xff]  }
  0x3c   :  { %904 = vmatpush3.bf16.msra.mxu1 %v1004_v20  ;;  %v1038_v3 = vld [vmem:[#allocation8 + $0x10] sm:$0xff]   ;;  %v1039_v4 = vld [vmem:[#allocation8 + $0x8] sm:$0xff]   ;;  %v1040_v5 = vld [vmem:[#allocation8] sm:$0xff]  }
  0x3d   :  { %905 = vmatprep.subr.bf16.mxu1 %v1007_v23  ;;  %v815_v15 = vld [vmem:[%s1206_s2] ss:$0 sm:$0xff] }
  0x3e   :  { %884 = vmatpush3.bf16.msra.mxu0 %v1006_v22  ;;  %v706_v35 = vld [vmem:[%s1209_s5] sm:$0x1] }
  0x3f   :  { %885 = vmatprep.subr.bf16.mxu0 %v1009_v25 }
  0x40   :  { %906 = vmatpush3.bf16.msra.mxu1 %v1008_v24 }
  0x41   :  { %907 = vmatprep.subr.bf16.mxu1 %v1011_v27  ;;  %v707_v27 = vld [vmem:[#allocation2] sm:$0x1] }
  0x42   :  { %886 = vmatpush3.bf16.msra.mxu0 %v1010_v26 }
  0x43   :  { %887 = vmatprep.subr.bf16.mxu0 %v1013_v29  ;;  %v864_v29 = vld [vmem:[%s1208_s4] ss:$0 sm:$0xff]  ;;  %s1139_s4 = smov [#allocation9]  }
  0x44   :  { %908 = vmatpush3.bf16.msra.mxu1 %v1012_v28  ;;  %v1138_v28 = vmov 0   ;;  %s805_s21 = sshll.u32 %s1139_s4, 4  ;;  %s806_s21 = int_to_ptr.vmem [resolvable:$true] %s805_s21 }
  0x45   :  { %909 = vmatprep.subr.bf16.mxu1 %v1015_v31  ;;  %984 = vset.pattern.permute.xlu0 %v1138_v28  ;;  %s1105_s5 = scalar_lea.vmem %s806_s21, 16  ;;  %s1109_s22 = scalar_lea.vmem %s806_s21, 32 }
  0x46   :  { %888 = vmatpush3.bf16.msra.mxu0 %v1014_v30  ;;  %710 = vperm.xlu0 %984, %v707_v27   ;;  %p1106_p1 = scmp.ne.s32.totalorder %s806_s21, %s1105_s5  ;;  %p1110_p2 = scmp.lt.s32.totalorder %s806_s21, %s806_s21 }
  0x47   :  { %917 = vmatprep.subr.bf16.mxu0 %v1017_v37  ;;  %v713_v37 = vlaneseq  ;;  %p1111_p3 = scmp.lt.s32.totalorder %s1109_s22, %s1105_s5 }
  0x48   :  { %910 = vmatpush3.bf16.msra.mxu1 %v1016_v34 }
  0x49   :  { %505 = vmatmul.mubr.bf16.vlgmr.msra.gmra.mxu0 %v75_v36  ;;  %950 = vmatprep.subr.bf16.mxu1 %v1136_v62  ;;  %v714_v38 = vshrl.u32 %v713_v37, 7  ;;  %p1112_p4 = por %p1111_p3, %p1110_p2 }
  0x4a   :  { %918 = vmatpush3.bf16.msra.mxu0 %v1018_v40  ;;  %584 = vmatprep.mubr.bf16.mxu0 %v80_v54 }
  0x4b   :  { %545 = vmatmul.mubr.bf16.vlgmr.msra.gmra.mxu1 %v77_v42  ;;  %919 = vmatprep.subr.bf16.mxu0 %v1019_v43  ;;  %v715_v39 = vsub.s32 0, %v714_v38  ;;  %p1113_p5 = pnand %p1112_p4, %p1106_p1 }
  0x4c   :  { %951 = vmatpush3.bf16.msra.mxu1 %v1033_v61  ;;  %966 = vmatprep.mubr.msk.bf16.mxu1 %vm1137_vm0, %v1136_v62 }
  0x4d   :  { %952 = vmatprep.subr.bf16.mxu1 %v1136_v62 }
  0x4e   :  { %920 = vmatpush3.bf16.msra.mxu0 %v1020_v44 }
  0x4f   :  { %921 = vmatprep.subr.bf16.mxu0 %v1021_v45 }
  0x50   :  { %953 = vmatpush3.bf16.msra.mxu1 %v1034_v63 }
  0x51   :  { %954 = vmatprep.subr.bf16.mxu1 %v1136_v62 }
  0x52   :  { %922 = vmatpush3.bf16.msra.mxu0 %v1022_v46 }
  0x53   :  { %923 = vmatprep.subr.bf16.mxu0 %v1023_v47 }
  0x54   :  { %955 = vmatpush3.bf16.msra.mxu1 %v1035_v0 }
  0x55   :  { %956 = vmatprep.subr.bf16.mxu1 %v1136_v62 }
  0x56   :  { %924 = vmatpush3.bf16.msra.mxu0 %v1024_v48 }
  0x57   :  { %925 = vmatprep.subr.bf16.mxu0 %v1025_v49 }
  0x58   :  { %957 = vmatpush3.bf16.msra.mxu1 %v1036_v1 }
  0x59   :  { %958 = vmatprep.subr.bf16.mxu1 %v1136_v62 }
  0x5a   :  { %926 = vmatpush3.bf16.msra.mxu0 %v1026_v50 }
  0x5b   :  { %927 = vmatprep.subr.bf16.mxu0 %v1027_v51 }
  0x5c   :  { %959 = vmatpush3.bf16.msra.mxu1 %v1037_v2 }
  0x5d   :  { %960 = vmatprep.subr.bf16.mxu1 %v1136_v62 }
  0x5e   :  { %928 = vmatpush3.bf16.msra.mxu0 %v1028_v53 }
  0x5f   :  { %929 = vmatprep.subr.bf16.mxu0 %v1029_v55 }
  0x60   :  { %961 = vmatpush3.bf16.msra.mxu1 %v1038_v3 }
  0x61   :  { %962 = vmatprep.subr.bf16.mxu1 %v1136_v62 }
  0x62   :  { %930 = vmatpush3.bf16.msra.mxu0 %v1030_v56 }
  0x63   :  { %931 = vmatprep.subr.bf16.mxu0 %v1031_v57 }
  0x64   :  { %963 = vmatpush3.bf16.msra.mxu1 %v1039_v4 }
  0x65   :  { %964 = vmatprep.subr.bf16.mxu1 %v1136_v62 }
  0x66   :  { %932 = vmatpush3.bf16.msra.mxu0 %v1032_v58 }
  0x67   :  { %970 = vmatprep.subr.mxu0 %v1136_v62 }
  0x68   :  { %965 = vmatpush3.bf16.msra.mxu1 %v1040_v5 }
  0x69   :  { %585 = vmatmul.mubr.bf16.vlgmr.msra.gmra.mxu0 %v79_v60 }
  0x6a   :  { %972 = vmatprep.mubr.msk.f32.mxu0 %vm1137_vm0, %v1136_v62 }
  0xc1   :  { %v711_v40 = vpop.permute.xlu0 %710 }
  0xc2   :  { %v716_v41 = vrot.slane %v711_v40, %v715_v39 }
 0x109   :  { %v889_v6 = vpop.f32.mrf.mxu0 }
 0x10b   :  { %v890_v7 = vpop.f32.mrf.mxu0  ;;  %v911_v8 = vpop.f32.mrf.mxu1 }
 0x10c   :  { %v891_v14 = vadd.f32 %v890_v7, %v889_v6 }
 0x10d   :  { %v892_v9 = vpop.f32.mrf.mxu0  ;;  %v912_v10 = vpop.f32.mrf.mxu1 }
 0x10e   :  { %v507_v16 = vadd.f32 %v891_v14, %v815_v15  ;;  %v913_v17 = vadd.f32 %v912_v10, %v911_v8 }
 0x10f   :  { %v893_v11 = vpop.f32.mrf.mxu0  ;;  %v914_v12 = vpop.f32.mrf.mxu1 }
 0x110   :  { %v547_v20 = vadd.f32 %v913_v17, %v507_v16 }
 0x111   :  { %v915_v13 = vpop.f32.mrf.mxu1 }
 0x129   :  { %v933_v18 = vpop.f32.mrf.mxu0 }
 0x12b   :  { %v934_v19 = vpop.f32.mrf.mxu0 }
 0x12c   :  { %v935_v21 = vadd.f32 %v934_v19, %v933_v18 }
 0x12d   :  { %v936_v22 = vpop.f32.mrf.mxu0 }
 0x12e   :  { %v587_v23 = vadd.f32 %v935_v21, %v547_v20 }
 0x12f   :  { %v937_v24 = vpop.f32.mrf.mxu0 }
 0x130   :  { %v592_v25 = vmax.f32 %v587_v23, 0.0 }
 0x132   :  { %v593_v26 = vpack.c.bf16 %v592_v25, %v592_v25 }
 0x134   :  { %967 = vmatmul.mubr.bf16.vlgmr.msra.gmra.mxu1 %v593_v26 }
 0x1f4   :  { %v699_v30 = vpop.f32.mrf.mxu1 }
 0x1f5   :  { %v700_v31 = vadd.f32 %v864_v29, %v699_v30 }
 0x1f6   :  { %v968_v32 = vpop.f32.mrf.mxu1 }
 0x1f7   :  { %v705_v33 = vmax.f32 %v700_v31, 0.0 }
 0x1f8   :  { %v702_v34 = vpop.f32.mrf.mxu1 }
 0x1f9   :  { %971 = vmatpush3.xpose.msra.mxu0 %v705_v33 }
 0x1fa   :  { %v969_v36 = vpop.f32.mrf.mxu1 }
 0x1fc   :  { %973 = vmatmul.mubr.f32.vlgmr.msra.gmra.mxu0 %v706_v35 }
 0x2bc   :  { %v783_v42 = vpop.f32.mrf.mxu0 }
 0x2bd   :  { %v784_v43 = vadd.f32 %v783_v42, %v716_v41 }
 0x2be   :  { %v974_v44 = vpop.f32.mrf.mxu0 }
 0x2bf   :  { %v787_v45 = vand.u32 2147483647, %v784_v43  ;;  %vm791_vm2 = vcmp.ge.f32.partialorder %v784_v43, 0.0 }
 0x2c1   :  { %v788_v46 = vsub.f32 0.0, %v787_v45 }
 0x2c3   :  { %v789_v47 = vmul.f32 1.442695, %v788_v46 }
 0x2c5   :  { %1041 = vpow2.f32 %v789_v47 }
 0x2d2   :  { %v1042_v48 = vpop.eup %1041 }
 0x2d3   :  { %v792_v49 = vadd.f32 1.0, %v1042_v48 }
 0x2d5   :  { %1043 = vrcp.f32 %v792_v49 }
 0x2e2   :  { %v1044_v50 = vpop.eup %1043 }
 0x2e3   :  { %v795_v51 = vmul.f32 %v1044_v50, %v1042_v48 }
 0x2e5   :  { %v796_v52 = vsel %vm791_vm2, %v1044_v50, %v795_v51 }
 0x2e6   :  { %798 = vst.msk [vmem:[#allocation9] sm:$0x1] %vm797_vm1, %v796_v52 }
 0x2e7   :  { %1116 = shalt.err (!%p1113_p5)
}
 0x2e8   :  { %808 = dma.vmem_to_hbm [thread:$0]  %s806_s21, 16, %s1211_s7, [#allocation5]  }
 0x2e9   :  { %1129 = dma.done.wait [#allocation5], 16  }
 0x2ea   :  { %1130 = vsyncadd [#allocation5], 4294967280 }
 0x2eb   :  { %812 = vsyncpa [#allocation4], 1 }
 0x2ec   :  { %813 = vsyncpa [#allocation7], 1 }
 0x2ed   :  { %814 = vsyncpa [#allocation5], 1 }

</bundles_post_ra>
